<compile_context>
chip_gen: v6e
topology: v6e:2x2x1
jax: 0.10.0
libtpu: 0.0.40
codegen_flags: <defaults>
</compile_context>

<pallas_src>
import jax
import jax.numpy as jnp
from jax.experimental import pallas as pl
from jax.experimental.pallas import tpu as pltpu


def _vmem_params():
    """(per-step byte budget, scoped vmem_limit_bytes) derived from the chip."""
    try:
        phys = int(pltpu.get_tpu_info().vmem_capacity_bytes)
    except Exception:
        phys = 64 * 1024 * 1024            # conservative fallback (v7x per-TC)
    limit = min((phys * 3) // 4, 96 * 1024 * 1024)       # v7x: 48 MiB, v5e/v6e: 96 MiB
    budget = max(12 * 1024 * 1024, min(limit // 2, 48 * 1024 * 1024))
    return budget, limit


def _addcoords_kernel(coord_ref, x_ref, o_ref):
    # coord_ref: (n_coord, T) precomputed xx/yy[/rr] slab for this spatial tile.
    # x_ref:     (BT, C, T) input tile;  o_ref: (BT, C + n_coord, T).
    B = x_ref.shape[0]
    C = x_ref.shape[1]

    # Pass-through of the original channels: one wide, lane-dense store.
    o_ref[:, :C, :] = x_ref[...]

    # Coord channels: direct per-batch-element stores (BT is small & static),
    # no concatenate/broadcast temporary to spill.
    for b in range(B):
        o_ref[b, C:, :] = coord_ref[...]


def _pick_hw_tile(hw: int, n: int, c_in: int, c_out: int, n_coord: int, budget: int) -> int:
    """Largest 128-aligned spatial tile that fits the per-step VMEM budget,
    while guaranteeing >=2 grid steps whenever possible (megacore on v7x)."""
    bytes_per_col = 2 * (c_in + c_out + n_coord) * 4   # double-buffered in/out + coord slab
    max_t = max(128, budget // bytes_per_col)

    if hw <= max_t:
        if n >= 2 or hw <= 128:
            return hw                       # full spatial extent; batch axis gives >=2 steps
        # N == 1: split the spatial axis into >=2 roughly-even 128-aligned tiles.
        half = ((hw // 2) // 128) * 128
        return max(128, half)

    t = max(128, (max_t // 128) * 128)
    # Prefer an exact divisor but never shrink below ~half of the optimal tile;
    # a ragged (masked) last block is cheaper than more grid steps.
    lo = max(128, ((t // 2) // 128) * 128)
    for cand in range(t, lo - 1, -128):
        if hw % cand == 0:
            return cand
    return t                                # ragged last block: Pallas masks the writeback


def _pick_batch_tile(n: int, c_in: int, c_out: int, t: int, n_hw_tiles: int, budget: int) -> int:
    """Fuse a few batch elements per block when the spatial extent is tiny."""
    if n_hw_tiles > 1 or n <= 1:
        return 1
    per_batch = 2 * (c_in + c_out) * t * 4
    bt = max(1, min(n, budget // max(per_batch, 1)))
    bt = min(bt, 8)                         # keep the in-kernel coord-store unroll short
    bt = min(bt, max(1, n // 2))            # always leave >=2 grid steps (v7x: 2 TensorCores)
    while n % bt:
        bt -= 1
    return bt


def add_coords(x: jax.Array, with_r: bool = False) -> jax.Array:
    """AddCoords forward (rank=2). x: (N, C, H, W)."""
    N, C, H, W = x.shape
    HW = H * W
    n_coord = 3 if with_r else 2
    C_out = C + n_coord

    budget, vmem_limit = _vmem_params()
    T = _pick_hw_tile(HW, N, C, C_out, n_coord, budget)
    n_t = pl.cdiv(HW, T)
    BT = _pick_batch_tile(N, C, C_out, T, n_t, budget)
    n_b = N // BT

    # Lane-dense view: flatten spatial dims into the last axis.
    x_flat = x.reshape(N, C, HW)

    # Precompute the coord slab host-side (tiny: n_coord * HW floats): the
    # kernel becomes pure streaming copies with no div/mod/sqrt work.
    flat = jnp.arange(HW, dtype=jnp.int32)
    ii = (flat // W).astype(jnp.float32)
    jj = (flat % W).astype(jnp.float32)
    # TODO(synk): PyTorch yields NaN/Inf for H==1 / W==1 (0/0 division); we emit -1 instead.
    sx = 2.0 / (H - 1) if H > 1 else 0.0
    sy = 2.0 / (W - 1) if W > 1 else 0.0
    xx = ii * sx - 1.0
    yy = jj * sy - 1.0
    parts = [xx, yy]
    if with_r:
        parts.append(jnp.sqrt((xx - 0.5) ** 2 + (yy - 0.5) ** 2))
    coord = jnp.stack(parts, axis=0).astype(x.dtype)   # (n_coord, HW)

    # Put the longer axis first so the megacore partitioner splits it across TCs.
    if n_t >= n_b:
        grid = (n_t, n_b)
        coord_map = lambda t, b: (0, t)
        x_map = lambda t, b: (b, 0, t)
    else:
        grid = (n_b, n_t)
        coord_map = lambda b, t: (0, t)
        x_map = lambda b, t: (b, 0, t)

    out_flat = pl.pallas_call(
        _addcoords_kernel,
        out_shape=jax.ShapeDtypeStruct((N, C_out, HW), x.dtype),
        grid_spec=pltpu.PrefetchScalarGridSpec(
            num_scalar_prefetch=0,
            grid=grid,
            in_specs=[
                pl.BlockSpec((n_coord, T), coord_map),      # coord slab
                pl.BlockSpec((BT, C, T), x_map),            # x
            ],
            out_specs=pl.BlockSpec((BT, C_out, T), x_map),
        ),
        compiler_params=pltpu.CompilerParams(
            dimension_semantics=("parallel", "parallel"),
            vmem_limit_bytes=vmem_limit,
        ),
    )(coord, x_flat)

    return out_flat.reshape(N, C_out, H, W)


def _add_coords_ref(x: jax.Array, with_r: bool = False) -> jax.Array:
    """Pure-JAX reference matching the PyTorch forward (rank=2)."""
    N, C, H, W = x.shape
    ii = jnp.arange(H, dtype=jnp.float32)[:, None]          # (H, 1)
    jj = jnp.arange(W, dtype=jnp.float32)[None, :]          # (1, W)
    xx = (ii / (H - 1) * 2.0 - 1.0) * jnp.ones((H, W), jnp.float32)
    yy = (jj / (W - 1) * 2.0 - 1.0) * jnp.ones((H, W), jnp.float32)
    xx_b = jnp.broadcast_to(xx[None, None], (N, 1, H, W))
    yy_b = jnp.broadcast_to(yy[None, None], (N, 1, H, W))
    parts = [x, xx_b.astype(x.dtype), yy_b.astype(x.dtype)]
    if with_r:
        rr = jnp.sqrt((xx_b - 0.5) ** 2 + (yy_b - 0.5) ** 2)
        parts.append(rr.astype(x.dtype))
    return jnp.concatenate(parts, axis=1)


if __name__ == "__main__":
    key = jax.random.PRNGKey(0)
    N, C, H, W = 2, 4, 16, 16
    x = jax.random.normal(key, (N, C, H, W), dtype=jnp.float32)

    # with_r = False
    out = add_coords(x, with_r=False)
    out = jax.block_until_ready(out)
    ref = _add_coords_ref(x, with_r=False)
    assert out.shape == (N, C + 2, H, W), out.shape
    assert jnp.allclose(out, ref, atol=1e-6), "mismatch (with_r=False)"

    # with_r = True
    out_r = add_coords(x, with_r=True)
    out_r = jax.block_until_ready(out_r)
    ref_r = _add_coords_ref(x, with_r=True)
    assert out_r.shape == (N, C + 3, H, W), out_r.shape
    assert jnp.allclose(out_r, ref_r, atol=1e-6), "mismatch (with_r=True)"

    # N == 1 with a non-128-multiple spatial extent: exercises the forced
    # spatial split (>=2 grid steps) and the ragged / masked last tile.
    key2 = jax.random.PRNGKey(1)
    x2 = jax.random.normal(key2, (1, 3, 20, 13), dtype=jnp.float32)
    out2 = jax.block_until_ready(add_coords(x2, with_r=True))
    ref2 = _add_coords_ref(x2, with_r=True)
    assert out2.shape == (1, 3 + 3, 20, 13), out2.shape
    assert jnp.allclose(out2, ref2, atol=1e-6), "mismatch (ragged spatial tile)"

    print("KERNEL_OK")
</pallas_src>

<mosaic_0001>
module attributes {stable_mosaic.version = 11 : i64} {
  func.func @_addcoords_kernel(%arg0: i32, %arg1: i32, %arg2: memref<2x256xf32, #tpu.memory_space<vmem>>, %arg3: memref<1x4x256xf32, #tpu.memory_space<vmem>>, %arg4: memref<1x6x256xf32, #tpu.memory_space<vmem>>) attributes {dimension_semantics = [#tpu.dimension_semantics<parallel>, #tpu.dimension_semantics<parallel>], iteration_bounds = array<i64: 2, 1>, scalar_prefetch = 0 : i64, scratch_operands = 0 : i64, tpu.core_type = #tpu.core_type<tc>, window_params = [{transform_indices = @transform_0, window_bounds = array<i64: 2, 256>}, {transform_indices = @transform_1, window_bounds = array<i64: 1, 4, 256>}, {transform_indices = @transform_2, window_bounds = array<i64: 1, 6, 256>}]} {
    %c0 = arith.constant 0 : index
    %c0_0 = arith.constant 0 : index
    %c0_1 = arith.constant 0 : index
    %0 = vector.load %arg3[%c0, %c0_0, %c0_1] : memref<1x4x256xf32, #tpu.memory_space<vmem>>, vector<1x4x256xf32>
    %c0_2 = arith.constant 0 : index
    %c0_3 = arith.constant 0 : index
    %c0_4 = arith.constant 0 : index
    %1 = vector.load %arg4[%c0_2, %c0_3, %c0_4] : memref<1x6x256xf32, #tpu.memory_space<vmem>>, vector<1x4x256xf32>
    tpu.vector_store %arg4[%c0_2, %c0_3, %c0_4], %0 {strides = array<i32>} : memref<1x6x256xf32, #tpu.memory_space<vmem>>, vector<1x4x256xf32>,
    %c0_5 = arith.constant 0 : index
    %c0_6 = arith.constant 0 : index
    %2 = vector.load %arg2[%c0_5, %c0_6] : memref<2x256xf32, #tpu.memory_space<vmem>>, vector<2x256xf32>
    %c0_7 = arith.constant 0 : index
    %c4 = arith.constant 4 : index
    %c0_8 = arith.constant 0 : index
    %3 = vector.load %arg4[%c0_7, %c4, %c0_8] : memref<1x6x256xf32, #tpu.memory_space<vmem>>, vector<1x2x256xf32>
    %4 = vector.shape_cast %3 : vector<1x2x256xf32> to vector<2x256xf32>
    %5 = vector.shape_cast %2 : vector<2x256xf32> to vector<1x2x256xf32>
    tpu.vector_store %arg4[%c0_7, %c4, %c0_8], %5 {strides = array<i32>} : memref<1x6x256xf32, #tpu.memory_space<vmem>>, vector<1x2x256xf32>,
    return
  }
  func.func @transform_0(%arg0: i32, %arg1: i32) -> (i32, i32) {
    %c0_i32 = arith.constant 0 : i32
    %c0_i32_0 = arith.constant 0 : i32
    return %c0_i32, %arg1 : i32, i32
  }
  func.func @transform_1(%arg0: i32, %arg1: i32) -> (i32, i32, i32) {
    %c0_i32 = arith.constant 0 : i32
    %c0_i32_0 = arith.constant 0 : i32
    return %arg0, %c0_i32, %arg1 : i32, i32, i32
  }
  func.func @transform_2(%arg0: i32, %arg1: i32) -> (i32, i32, i32) {
    %c0_i32 = arith.constant 0 : i32
    %c0_i32_0 = arith.constant 0 : i32
    return %arg0, %c0_i32, %arg1 : i32, i32, i32
  }
}

</mosaic_0001>

<bundles_post_ra>
// kernel: tpu_custom_call.1
= control target key start
LH: loop header
LB: loop body
LE: loop exit
PB: predicated region body
PF: predicated region fallthrough
CT: control target
= control target key end

     0   :  { %7 = vsyncpa [#allocation3], 0  ;;  %s674_s0 = inlined_call_operand.hbm [shape: f32[2,256], index: 0, kind: input, shape index: {}]   ;;  %s675_s1 = inlined_call_operand.hbm [shape: f32[2,4,256], index: 1, kind: input, shape index: {}]   ;;  %s676_s2 = inlined_call_operand.vmem [shape: f32[2,6,256], index: 2, kind: output, shape index: {}]  }
   0x1   :  { %8 = vsyncpa [#allocation5], 0 }
   0x2   :  { %10 = vsyncpa [#allocation5 + $0x1], 0  ;;  %s553_s9 = smov 0   ;;  %s555_s10 = smov 0  }
   0x3   :  { %s557_s11 = smov 0   ;;  %s559_s12 = smov 0  }
   0x4   :  { %s561_s13 = smov 0   ;;  %s563_s14 = smov 0  }
   0x5 LB: > { %s341_s15 = sadd.s32 4294967295, %s534_s14   ;;  %p76_p0 = scmp.ne.s32.totalorder %s518_s10, %s514_s9  ;;  %s534_s14 = sphi %s563_s14, %s16_s14   ;;  %s530_s13 = sphi %s561_s13, %s686_s13   ;;  %s526_s12 = sphi %s559_s12, %s685_s12   ;;  %s522_s11 = sphi %s557_s11, %s684_s11   ;;  %s518_s10 = sphi %s555_s10, %s683_s10   ;;  %s514_s9 = sphi %s553_s9, %s682_s9  }
   0x6   : > { %p583_p1 = scmp.eq.s32.totalorder %s341_s15, 0  ;;  %p343_p2 = scmp.ge.s32.totalorder %s534_s14, 1 }
   0x7   : > { %p115_p3 = scmp.lt.s32.totalorder %s534_s14, 3  ;;  %s536_s19 = smov [#allocation2]  }
   0x8   : > { %p591_p4 = por %p583_p1, %p76_p0  ;;  %s131_s20 = sshll.u32 %s536_s19, 4  ;;  %s132_s20 = int_to_ptr.vmem [resolvable:$true] %s131_s20 }
   0x9   : > { %p595_p5 = pnand %p343_p2, %p115_p3  ;;  %s28_s22 = sadd.s32 1, %s530_s13 }
   0xa   : > { %s63_s23 = sadd.s32 1, %s522_s11  ;;  %p30_p8 = scmp.ge.s32.totalorder %s28_s22, 2 }
   0xb   : > { %p365_p6 = pneg %p595_p5  ;;  %s437_s24 = scalar_lea.vmem %s132_s20, 64 }
   0xc   : > { %p438_p10 = scmp.ne.s32.totalorder %s132_s20, %s437_s24  ;;  %p445_p13 = scmp.lt.s32.totalorder %s132_s20, %s132_s20 }
   0xd   : > { %p603_p7 = pnand %p365_p6, %p583_p1  ;;  %p446_p0 = scmp.lt.s32.totalorder %s437_s24, %s437_s24 }
   0xf   : > { %p428_p9 = pneg %p603_p7  ;;  %p447_p2 = por %p446_p0, %p445_p13 }
  0x11   : > { %p440_p11 = pnand %p438_p10, %p428_p9 }
  0x13   : > { %p441_p12 = pneg %p440_p11 }
  0x15   : > { %p448_p3 = pnand %p447_p2, %p441_p12 }
  0x17   : > { %451 = shalt.err (!%p448_p3)
}
  0x18   : > { %368 = dma.hbm_to_vmem [thread:$0]  (!%p603_p7), %s674_s0, 64, %s132_s20, [#allocation3]  }
  0x19   : > { %s688_s22 = smov (%p30_p8, %s28_s22), 0  ;;  %p70_p6 = scmp.ne.s32.totalorder %s522_s11, %s518_s10 }
  0x1a   : > { %p71_p9 = scmp.eq.s32.totalorder %s534_s14, 0  ;;  %s58_s27 = ssub.s32 %s530_s13, %s688_s22 }
  0x1b   : > { %p374_p10 = scmp.lt.s32.totalorder %s534_s14, 2  ;;  %p61_p11 = scmp.eq.s32.totalorder %s58_s27, 0 }
  0x1c   : > { %p72_p12 = por %p71_p9, %p70_p6  ;;  %s142_s28 = sand.u32 1, %s522_s11  }
  0x1d   : > { %s357_s29 = sshll.u32 %s530_s13, 7  ;;  %s346_s3 = sshll.u32 %s142_s28, 3 }
  0x1e   : > { %s627_s30 = scalar_select %p61_p11, %s522_s11, %s63_s23  }
  0x1f   : > { %s154_s6 = scalar_lea.hbm %s675_s1, %s357_s29  ;;  %s146_s7 = scalar_lea.vmem [#allocation4], %s346_s3 }
  0x20   : > { %s156_s8 = sshll.u32 %s146_s7, 4  ;;  %p632_p7 = pnand %p374_p10, %p72_p12  ;;  %s157_s8 = int_to_ptr.vmem [resolvable:$true] %s156_s8 }
  0x21   : > { %s143_s15 = scalar_lea.sflag [#allocation5], %s142_s28  ;;  %s465_s19 = scalar_lea.vmem %s157_s8, 128 }
  0x22   : > { %p454_p8 = pneg %p632_p7  ;;  %p466_p13 = scmp.ne.s32.totalorder %s157_s8, %s465_s19 }
  0x23   : > { %s537_s20 = smov [#allocation4]  }
  0x24   : > { %p468_p0 = pnand %p466_p13, %p454_p8  ;;  %s470_s21 = sshll.u32 %s537_s20, 4  ;;  %s471_s21 = int_to_ptr.vmem [resolvable:$false] %s470_s21 }
  0x25   : > { %s472_s23 = scalar_lea.vmem %s471_s21, 256  ;;  %p473_p3 = scmp.lt.s32.totalorder %s157_s8, %s471_s21 }
  0x26   : > { %p469_p2 = pneg %p468_p0  ;;  %p474_p6 = scmp.lt.s32.totalorder %s472_s23, %s465_s19 }
  0x28   : > { %p475_p9 = por %p474_p6, %p473_p3 }
  0x2a   : > { %p476_p10 = pnand %p475_p9, %p469_p2 }
  0x2c   : > { %479 = shalt.err (!%p476_p10)
}
  0x2d   : > { %372 = dma.hbm_to_vmem [thread:$0]  (!%p632_p7), %s154_s6, 128, %s157_s8, %s143_s15  }
  0x2e   : > { %165 = sbr.rel (%p595_p5) target bundleno = 63 (0x3f), region = 28 }
  0x33   : > { %505 = dma.done.wait (%p583_p1), [#allocation3], 64  }
  0x34   : > { %507 = vsyncadd (%p583_p1), [#allocation3], 4294967232  ;;  %s171_s24 = sand.u32 1, %s518_s10  }
  0x35   : > { %s351_s25 = sshll.u32 %s171_s24, 3  ;;  %s172_s26 = scalar_lea.sflag [#allocation5], %s171_s24 }
  0x36   : > { %s175_s27 = scalar_lea.vmem [#allocation4], %s351_s25 }
  0x37   : > { %509 = dma.done.wait (%p591_p4), %s172_s26, 128  }
  0x38   : > { %511 = vsyncadd (%p591_p4), %s172_s26, 4294967168  ;;  %p203_p5 = scmp.lt.s32.totalorder %s526_s12, 1  ;;  %v212_v0 = vld [vmem:[%s175_s27] sm:$0xff] }
  0x39   : > { %v354_v1 = vld.sshfl [vmem:[#allocation2] sm:$0x33 pattern:$0x76325410]  ;;  %v214_v2 = vcombine.high %v212_v0, %v212_v0 }
  0x3a   : > { %s690_s12 = smov (!%p203_p5, %s526_s12), 1  ;;  %v227_v3 = vcombine.low %v354_v1, %v354_v1 }
  0x3b   : > { %s358_s18 = sshll.u32 %s690_s12, 4 }
  0x3c   : > { %s210_s16 = scalar_lea.vmem %s676_s2, %s358_s18 }
  0x3d   : > { %216 = vst [vmem:[%s210_s16] sm:$0xf] %v212_v0  ;;  %231 = vst [vmem:[%s210_s16 + $0x8] sm:$0x30] %v354_v1 }
  0x3e   : > { %217 = vst [vmem:[%s210_s16 + $0x8] sm:$0xf] %v214_v2  ;;  %230 = vst [vmem:[%s210_s16] sm:$0x30] %v227_v3 }
  0x3f PF: > { %s16_s14 = sadd.s32 1, %s534_s14   ;;  %s682_s9 = smov %s518_s10 }
  0x40   : > { %p13_p1 = scmp.ge.s32.totalorder %s16_s14, 4   ;;  %s683_s10 = smov %s522_s11 }
  0x41   : > { %s684_s11 = smov %s627_s30  ;;  %s685_s12 = smov %s530_s13 }
  0x42   : > { %s686_s13 = smov %s688_s22  ;;  %15 = sbr.rel (!%p13_p1) target bundleno = 5 (0x5), region = 74 }
  0x47   :  { %262 = vsyncpa [#allocation3], 1 }
  0x48   :  { %264 = vsyncpa [#allocation3 + $0x1], 1 }
  0x49   :  { %265 = vsyncpa [#allocation5], 1 }
  0x4a   :  { %267 = vsyncpa [#allocation5 + $0x1], 1 }

</bundles_post_ra>
